<compile_context>
chip_gen: v6e
topology: v6e:2x2x1
jax: 0.10.0
libtpu: 0.0.40
codegen_flags: <defaults>
</compile_context>

<pallas_src>
import functools

import jax
import jax.numpy as jnp
from jax.experimental import pallas as pl
from jax.experimental.pallas import tpu as pltpu

LANE = 128
SUBLANE = 8
MAX_TILE_B = 128  # MXU-filling batch tile; sweep 128/256 for large-batch training


def _round_up(x, m):
    return (x + m - 1) // m * m


def _rnn_agent_kernel(x_ref, h_ref, w1_ref, wi_ref, wh_ref, bias_ref, w2_ref,
                      q_ref, hout_ref, *, hp, nap):
    """One batch tile of: q, h' = fc2(GRUCell(relu(fc1(x)), h)).

    Bias pack layout (1, 5*hp + nap):
      [0:hp]        b1
      [hp:4hp]      b_ir+b_hr | b_iz+b_hz | b_in      (input-side gate biases)
      [4hp:5hp]     b_hn                              (kept separate: scaled by r)
      [5hp:5hp+nap] b2
    """
    x = x_ref[...]
    h = h_ref[...]

    b1 = bias_ref[:, 0:hp]
    bi = bias_ref[:, hp:4 * hp]
    bhn = bias_ref[:, 4 * hp:5 * hp]
    b2 = bias_ref[:, 5 * hp:5 * hp + nap]

    # x1 = relu(fc1(x));  K = input_dim (unpadded, Mosaic pads in-vreg).
    x1 = jnp.maximum(
        jnp.dot(x, w1_ref[...], preferred_element_type=jnp.float32) + b1, 0.0)

    # Fused GRU gate matmuls: two (tile_b, Hp) x (Hp, 3Hp) MXU pushes.
    gi = jnp.dot(x1, wi_ref[...], preferred_element_type=jnp.float32) + bi
    gh = jnp.dot(h, wh_ref[...], preferred_element_type=jnp.float32)

    # PyTorch GRUCell semantics (gate order r, z, n):
    r = jax.nn.sigmoid(gi[:, 0:hp] + gh[:, 0:hp])
    z = jax.nn.sigmoid(gi[:, hp:2 * hp] + gh[:, hp:2 * hp])
    n = jnp.tanh(gi[:, 2 * hp:3 * hp] + r * (gh[:, 2 * hp:3 * hp] + bhn))
    h_new = (1.0 - z) * n + z * h

    # q = fc2(h')
    q = jnp.dot(h_new, w2_ref[...], preferred_element_type=jnp.float32) + b2

    q_ref[...] = q
    hout_ref[...] = h_new


def pack_params(params, input_dim, hidden_dim, n_actions):
    """One-time packing of PyTorch-layout weights into padded, fused arrays."""
    H = hidden_dim
    Hp = _round_up(H, LANE)
    Nap = _round_up(n_actions, LANE)

    def pad2(w, rows, cols):
        w = jnp.asarray(w, jnp.float32)
        return jnp.zeros((rows, cols), jnp.float32).at[:w.shape[0], :w.shape[1]].set(w)

    def pad1(b, n):
        b = jnp.asarray(b, jnp.float32)
        return jnp.zeros((n,), jnp.float32).at[:b.shape[0]].set(b)

    # fc1: (H, Din) -> (Din, H) -> (Din, Hp)   (rows kept at true input_dim)
    w1 = pad2(params["fc1_w"].T, input_dim, Hp)

    w_ih = jnp.asarray(params["gru_w_ih"], jnp.float32)  # (3H, H), gates r|z|n
    w_hh = jnp.asarray(params["gru_w_hh"], jnp.float32)
    b_ih = jnp.asarray(params["gru_b_ih"], jnp.float32)
    b_hh = jnp.asarray(params["gru_b_hh"], jnp.float32)

    def gate_w(w, g):  # per-gate (H, H), transposed and padded to (Hp, Hp)
        return pad2(w[g * H:(g + 1) * H].T, Hp, Hp)

    wi = jnp.concatenate([gate_w(w_ih, 0), gate_w(w_ih, 1), gate_w(w_ih, 2)], axis=1)
    wh = jnp.concatenate([gate_w(w_hh, 0), gate_w(w_hh, 1), gate_w(w_hh, 2)], axis=1)

    # fc2: (A, H) -> (H, A) -> (Hp, Nap)
    w2 = pad2(params["fc2_w"].T, Hp, Nap)

    bias_pack = jnp.concatenate([
        pad1(params["fc1_b"], Hp),
        pad1(b_ih[0:H] + b_hh[0:H], Hp),          # r: b_ir + b_hr (pre-summed)
        pad1(b_ih[H:2 * H] + b_hh[H:2 * H], Hp),  # z: b_iz + b_hz (pre-summed)
        pad1(b_ih[2 * H:3 * H], Hp),              # n: b_in
        pad1(b_hh[2 * H:3 * H], Hp),              # n: b_hn (stays separate)
        pad1(params["fc2_b"], Nap),
    ]).reshape(1, 5 * Hp + Nap)

    return {
        "w1": w1, "wi": wi, "wh": wh, "w2": w2, "bias": bias_pack,
        "dims": (input_dim, H, n_actions, Hp, Nap),
    }


def make_rnn_agent_forward(packed):
    """Returns a jitted forward(inputs, hidden_state) -> (q, h)."""
    input_dim, H, n_actions, Hp, Nap = packed["dims"]
    w1, wi, wh, w2, bias = (packed["w1"], packed["wi"], packed["wh"],
                            packed["w2"], packed["bias"])
    kernel = functools.partial(_rnn_agent_kernel, hp=Hp, nap=Nap)

    @jax.jit
    def forward(inputs, hidden_state):
        B = inputs.shape[0]
        tile_b = min(MAX_TILE_B, _round_up(B, SUBLANE))
        Bp = _round_up(B, tile_b)

        # x stays at its true feature width; only pad batch rows if needed.
        x_p = inputs.astype(jnp.float32)
        if Bp != B:
            x_p = jnp.zeros((Bp, input_dim), jnp.float32).at[:B].set(x_p)

        h_in = hidden_state.reshape(-1, H).astype(jnp.float32)
        if h_in.shape[0] == 1 and B > 1:   # init_hidden() returns (1, H)
            h_in = jnp.broadcast_to(h_in, (B, H))
        h_pad = jnp.zeros((Bp, Hp), jnp.float32).at[:B, :H].set(h_in)

        # Advisory cost hint so XLA overlaps the surrounding pad/slice ops.
        flops = 2 * Bp * (input_dim * Hp + 6 * Hp * Hp + Hp * Nap)
        transcendentals = 3 * Bp * Hp
        bytes_accessed = 4 * (w1.size + wi.size + wh.size + w2.size + bias.size
                              + Bp * (input_dim + 2 * Hp + Nap))

        q_pad, h_out = pl.pallas_call(
            kernel,
            out_shape=(
                jax.ShapeDtypeStruct((Bp, Nap), jnp.float32),
                jax.ShapeDtypeStruct((Bp, Hp), jnp.float32),
            ),
            grid=(Bp // tile_b,),
            in_specs=[
                pl.BlockSpec((tile_b, input_dim), lambda i: (i, 0)),    # x (unpadded lanes)
                pl.BlockSpec((tile_b, Hp), lambda i: (i, 0)),           # h
                pl.BlockSpec((input_dim, Hp), lambda i: (0, 0)),        # w1
                pl.BlockSpec((Hp, 3 * Hp), lambda i: (0, 0)),           # Wi_cat
                pl.BlockSpec((Hp, 3 * Hp), lambda i: (0, 0)),           # Wh_cat
                pl.BlockSpec((1, 5 * Hp + Nap), lambda i: (0, 0)),      # biases
                pl.BlockSpec((Hp, Nap), lambda i: (0, 0)),              # w2
            ],
            out_specs=(
                pl.BlockSpec((tile_b, Nap), lambda i: (i, 0)),          # q
                pl.BlockSpec((tile_b, Hp), lambda i: (i, 0)),           # h'
            ),
            input_output_aliases={1: 1},  # hidden in -> hidden out
            compiler_params=pltpu.CompilerParams(
                dimension_semantics=("parallel",)),
            cost_estimate=pl.CostEstimate(
                flops=flops, transcendentals=transcendentals,
                bytes_accessed=bytes_accessed),
        )(x_p, h_pad, w1, wi, wh, bias, w2)

        return q_pad[:B, :n_actions], h_out[:B, :H]

    return forward


def _init_params(key, input_dim, hidden_dim, n_actions):
    """Deterministic synthetic parameters, PyTorch layouts."""
    ks = jax.random.split(key, 8)
    u = lambda k, shape, scale: jax.random.uniform(
        k, shape, jnp.float32, minval=-scale, maxval=scale)
    s1 = 1.0 / jnp.sqrt(input_dim)
    sh = 1.0 / jnp.sqrt(hidden_dim)
    return {
        "fc1_w": u(ks[0], (hidden_dim, input_dim), s1),
        "fc1_b": u(ks[1], (hidden_dim,), s1),
        "gru_w_ih": u(ks[2], (3 * hidden_dim, hidden_dim), sh),
        "gru_w_hh": u(ks[3], (3 * hidden_dim, hidden_dim), sh),
        "gru_b_ih": u(ks[4], (3 * hidden_dim,), sh),
        "gru_b_hh": u(ks[5], (3 * hidden_dim,), sh),
        "fc2_w": u(ks[6], (n_actions, hidden_dim), sh),
        "fc2_b": u(ks[7], (n_actions,), sh),
    }


if __name__ == "__main__":
    B, INPUT_DIM, HIDDEN, N_ACTIONS = 8, 24, 32, 8

    key = jax.random.PRNGKey(0)
    k_in, k_h, k_p = jax.random.split(key, 3)
    inputs = jax.random.normal(k_in, (B, INPUT_DIM), jnp.float32)
    # init_hidden() in the module returns zeros of shape (1, H); batch-broadcast.
    hidden = jnp.zeros((B, HIDDEN), jnp.float32)
    params = _init_params(k_p, INPUT_DIM, HIDDEN, N_ACTIONS)

    packed = pack_params(params, INPUT_DIM, HIDDEN, N_ACTIONS)  # once, off the hot path
    forward = make_rnn_agent_forward(packed)

    q, h = forward(inputs, hidden)
    jax.block_until_ready((q, h))

    # Pure-JAX float32 reference (PyTorch GRUCell semantics).
    H = HIDDEN
    x1 = jnp.maximum(inputs @ params["fc1_w"].T + params["fc1_b"], 0.0)
    gi = x1 @ params["gru_w_ih"].T + params["gru_b_ih"]
    gh = hidden @ params["gru_w_hh"].T + params["gru_b_hh"]
    r = jax.nn.sigmoid(gi[:, :H] + gh[:, :H])
    z = jax.nn.sigmoid(gi[:, H:2 * H] + gh[:, H:2 * H])
    n = jnp.tanh(gi[:, 2 * H:] + r * gh[:, 2 * H:])
    h_ref = (1.0 - z) * n + z * hidden
    q_ref = h_ref @ params["fc2_w"].T + params["fc2_b"]

    assert jnp.allclose(q, q_ref, atol=1e-5, rtol=1e-5), "q mismatch"
    assert jnp.allclose(h, h_ref, atol=1e-5, rtol=1e-5), "h mismatch"
    print("KERNEL_OK")
</pallas_src>

<mosaic_0001>
module attributes {stable_mosaic.version = 11 : i64} {
  func.func @_rnn_agent_kernel(%arg0: i32, %arg1: memref<8x24xf32, #tpu.memory_space<vmem>>, %arg2: memref<8x128xf32, #tpu.memory_space<vmem>>, %arg3: memref<24x128xf32, #tpu.memory_space<vmem>>, %arg4: memref<128x384xf32, #tpu.memory_space<vmem>>, %arg5: memref<128x384xf32, #tpu.memory_space<vmem>>, %arg6: memref<1x768xf32, #tpu.memory_space<vmem>>, %arg7: memref<128x128xf32, #tpu.memory_space<vmem>>, %arg8: memref<8x128xf32, #tpu.memory_space<vmem>>, %arg9: memref<8x128xf32, #tpu.memory_space<vmem>>) attributes {dimension_semantics = [#tpu.dimension_semantics<parallel>], iteration_bounds = array<i64: 1>, scalar_prefetch = 0 : i64, scratch_operands = 0 : i64, tpu.core_type = #tpu.core_type<tc>, window_params = [{transform_indices = @transform_0, window_bounds = array<i64: 8, 24>}, {transform_indices = @transform_1, window_bounds = array<i64: 8, 128>}, {pipeline_mode = #tpu.pipeline_mode<synchronous>, transform_indices = @transform_2, window_bounds = array<i64: 24, 128>}, {pipeline_mode = #tpu.pipeline_mode<synchronous>, transform_indices = @transform_3, window_bounds = array<i64: 128, 384>}, {pipeline_mode = #tpu.pipeline_mode<synchronous>, transform_indices = @transform_4, window_bounds = array<i64: 128, 384>}, {pipeline_mode = #tpu.pipeline_mode<synchronous>, transform_indices = @transform_5, window_bounds = array<i64: 1, 768>}, {pipeline_mode = #tpu.pipeline_mode<synchronous>, transform_indices = @transform_6, window_bounds = array<i64: 128, 128>}, {transform_indices = @transform_7, window_bounds = array<i64: 8, 128>}, {transform_indices = @transform_8, window_bounds = array<i64: 8, 128>}]} {
    %c0 = arith.constant 0 : index
    %c0_0 = arith.constant 0 : index
    %0 = vector.load %arg1[%c0, %c0_0] : memref<8x24xf32, #tpu.memory_space<vmem>>, vector<8x24xf32>
    %c0_1 = arith.constant 0 : index
    %c0_2 = arith.constant 0 : index
    %1 = vector.load %arg2[%c0_1, %c0_2] : memref<8x128xf32, #tpu.memory_space<vmem>>, vector<8x128xf32>
    %c0_3 = arith.constant 0 : index
    %c0_4 = arith.constant 0 : index
    %2 = vector.load %arg6[%c0_3, %c0_4] : memref<1x768xf32, #tpu.memory_space<vmem>>, vector<1x128xf32>
    %c0_5 = arith.constant 0 : index
    %c128 = arith.constant 128 : index
    %3 = vector.load %arg6[%c0_5, %c128] : memref<1x768xf32, #tpu.memory_space<vmem>>, vector<1x384xf32>
    %c0_6 = arith.constant 0 : index
    %c512 = arith.constant 512 : index
    %4 = vector.load %arg6[%c0_6, %c512] : memref<1x768xf32, #tpu.memory_space<vmem>>, vector<1x128xf32>
    %c0_7 = arith.constant 0 : index
    %c640 = arith.constant 640 : index
    %5 = vector.load %arg6[%c0_7, %c640] : memref<1x768xf32, #tpu.memory_space<vmem>>, vector<1x128xf32>
    %c0_8 = arith.constant 0 : index
    %c0_9 = arith.constant 0 : index
    %6 = vector.load %arg3[%c0_8, %c0_9] : memref<24x128xf32, #tpu.memory_space<vmem>>, vector<24x128xf32>
    %cst = arith.constant dense<0.000000e+00> : vector<8x128xf32>
    %7 = tpu.matmul %0, %6, %cst {dimension_numbers = #tpu.dot_dimension_numbers<[1], [0], [0], [1], [0, 0, 1, 1], [], []>} : vector<8x24xf32>, vector<24x128xf32>, vector<8x128xf32> -> vector<8x128xf32>
    %8 = vector.broadcast %2 : vector<1x128xf32> to vector<8x128xf32>
    %9 = arith.addf %7, %8 : vector<8x128xf32>
    %cst_10 = arith.constant 0.000000e+00 : f32
    %10 = vector.broadcast %cst_10 : f32 to vector<8x128xf32>
    %11 = arith.maximumf %9, %10 : vector<8x128xf32>
    %c0_11 = arith.constant 0 : index
    %c0_12 = arith.constant 0 : index
    %12 = vector.load %arg4[%c0_11, %c0_12] : memref<128x384xf32, #tpu.memory_space<vmem>>, vector<128x384xf32>
    %cst_13 = arith.constant dense<0.000000e+00> : vector<8x384xf32>
    %13 = tpu.matmul %11, %12, %cst_13 {dimension_numbers = #tpu.dot_dimension_numbers<[1], [0], [0], [1], [0, 0, 1, 1], [], []>} : vector<8x128xf32>, vector<128x384xf32>, vector<8x384xf32> -> vector<8x384xf32>
    %14 = vector.broadcast %3 : vector<1x384xf32> to vector<8x384xf32>
    %15 = arith.addf %13, %14 : vector<8x384xf32>
    %c0_14 = arith.constant 0 : index
    %c0_15 = arith.constant 0 : index
    %16 = vector.load %arg5[%c0_14, %c0_15] : memref<128x384xf32, #tpu.memory_space<vmem>>, vector<128x384xf32>
    %cst_16 = arith.constant dense<0.000000e+00> : vector<8x384xf32>
    %17 = tpu.matmul %1, %16, %cst_16 {dimension_numbers = #tpu.dot_dimension_numbers<[1], [0], [0], [1], [0, 0, 1, 1], [], []>} : vector<8x128xf32>, vector<128x384xf32>, vector<8x384xf32> -> vector<8x384xf32>
    %18 = vector.extract_strided_slice %15 {offsets = [0, 0], sizes = [8, 128], strides = [1, 1]} : vector<8x384xf32> to vector<8x128xf32>
    %19 = vector.extract_strided_slice %17 {offsets = [0, 0], sizes = [8, 128], strides = [1, 1]} : vector<8x384xf32> to vector<8x128xf32>
    %20 = arith.addf %18, %19 : vector<8x128xf32>
    %21 = arith.negf %20 : vector<8x128xf32>
    %22 = math.exp %21 : vector<8x128xf32>
    %cst_17 = arith.constant 1.000000e+00 : f32
    %23 = vector.broadcast %cst_17 : f32 to vector<8x128xf32>
    %24 = arith.addf %23, %22 : vector<8x128xf32>
    %25 = arith.divf %23, %24 : vector<8x128xf32>
    %26 = vector.extract_strided_slice %15 {offsets = [0, 128], sizes = [8, 128], strides = [1, 1]} : vector<8x384xf32> to vector<8x128xf32>
    %27 = vector.extract_strided_slice %17 {offsets = [0, 128], sizes = [8, 128], strides = [1, 1]} : vector<8x384xf32> to vector<8x128xf32>
    %28 = arith.addf %26, %27 : vector<8x128xf32>
    %29 = arith.negf %28 : vector<8x128xf32>
    %30 = math.exp %29 : vector<8x128xf32>
    %cst_18 = arith.constant 1.000000e+00 : f32
    %31 = vector.broadcast %cst_18 : f32 to vector<8x128xf32>
    %32 = arith.addf %31, %30 : vector<8x128xf32>
    %33 = arith.divf %31, %32 : vector<8x128xf32>
    %34 = vector.extract_strided_slice %15 {offsets = [0, 256], sizes = [8, 128], strides = [1, 1]} : vector<8x384xf32> to vector<8x128xf32>
    %35 = vector.extract_strided_slice %17 {offsets = [0, 256], sizes = [8, 128], strides = [1, 1]} : vector<8x384xf32> to vector<8x128xf32>
    %36 = vector.broadcast %4 : vector<1x128xf32> to vector<8x128xf32>
    %37 = arith.addf %35, %36 : vector<8x128xf32>
    %38 = arith.mulf %25, %37 : vector<8x128xf32>
    %39 = arith.addf %34, %38 : vector<8x128xf32>
    %40 = math.tanh %39 : vector<8x128xf32>
    %cst_19 = arith.constant 1.000000e+00 : f32
    %41 = vector.broadcast %cst_19 : f32 to vector<8x128xf32>
    %42 = arith.subf %41, %33 : vector<8x128xf32>
    %43 = arith.mulf %42, %40 : vector<8x128xf32>
    %44 = arith.mulf %33, %1 : vector<8x128xf32>
    %45 = arith.addf %43, %44 : vector<8x128xf32>
    %c0_20 = arith.constant 0 : index
    %c0_21 = arith.constant 0 : index
    %46 = vector.load %arg7[%c0_20, %c0_21] : memref<128x128xf32, #tpu.memory_space<vmem>>, vector<128x128xf32>
    %cst_22 = arith.constant dense<0.000000e+00> : vector<8x128xf32>
    %47 = tpu.matmul %45, %46, %cst_22 {dimension_numbers = #tpu.dot_dimension_numbers<[1], [0], [0], [1], [0, 0, 1, 1], [], []>} : vector<8x128xf32>, vector<128x128xf32>, vector<8x128xf32> -> vector<8x128xf32>
    %48 = vector.broadcast %5 : vector<1x128xf32> to vector<8x128xf32>
    %49 = arith.addf %47, %48 : vector<8x128xf32>
    %c0_23 = arith.constant 0 : index
    %c0_24 = arith.constant 0 : index
    %50 = vector.load %arg8[%c0_23, %c0_24] : memref<8x128xf32, #tpu.memory_space<vmem>>, vector<8x128xf32>
    tpu.vector_store %arg8[%c0_23, %c0_24], %49 {strides = array<i32>} : memref<8x128xf32, #tpu.memory_space<vmem>>, vector<8x128xf32>,
    %c0_25 = arith.constant 0 : index
    %c0_26 = arith.constant 0 : index
    %51 = vector.load %arg9[%c0_25, %c0_26] : memref<8x128xf32, #tpu.memory_space<vmem>>, vector<8x128xf32>
    tpu.vector_store %arg9[%c0_25, %c0_26], %45 {strides = array<i32>} : memref<8x128xf32, #tpu.memory_space<vmem>>, vector<8x128xf32>,
    return
  }
  func.func @transform_0(%arg0: i32) -> (i32, i32) {
    %c0_i32 = arith.constant 0 : i32
    %c0_i32_0 = arith.constant 0 : i32
    return %arg0, %c0_i32 : i32, i32
  }
  func.func @transform_1(%arg0: i32) -> (i32, i32) {
    %c0_i32 = arith.constant 0 : i32
    %c0_i32_0 = arith.constant 0 : i32
    return %arg0, %c0_i32 : i32, i32
  }
  func.func @transform_2(%arg0: i32) -> (i32, i32) {
    %c0_i32 = arith.constant 0 : i32
    %c0_i32_0 = arith.constant 0 : i32
    %c0_i32_1 = arith.constant 0 : i32
    return %c0_i32, %c0_i32_0 : i32, i32
  }
  func.func @transform_3(%arg0: i32) -> (i32, i32) {
    %c0_i32 = arith.constant 0 : i32
    %c0_i32_0 = arith.constant 0 : i32
    %c0_i32_1 = arith.constant 0 : i32
    return %c0_i32, %c0_i32_0 : i32, i32
  }
  func.func @transform_4(%arg0: i32) -> (i32, i32) {
    %c0_i32 = arith.constant 0 : i32
    %c0_i32_0 = arith.constant 0 : i32
    %c0_i32_1 = arith.constant 0 : i32
    return %c0_i32, %c0_i32_0 : i32, i32
  }
  func.func @transform_5(%arg0: i32) -> (i32, i32) {
    %c0_i32 = arith.constant 0 : i32
    %c0_i32_0 = arith.constant 0 : i32
    %c0_i32_1 = arith.constant 0 : i32
    return %c0_i32, %c0_i32_0 : i32, i32
  }
  func.func @transform_6(%arg0: i32) -> (i32, i32) {
    %c0_i32 = arith.constant 0 : i32
    %c0_i32_0 = arith.constant 0 : i32
    %c0_i32_1 = arith.constant 0 : i32
    return %c0_i32, %c0_i32_0 : i32, i32
  }
  func.func @transform_7(%arg0: i32) -> (i32, i32) {
    %c0_i32 = arith.constant 0 : i32
    %c0_i32_0 = arith.constant 0 : i32
    return %arg0, %c0_i32 : i32, i32
  }
  func.func @transform_8(%arg0: i32) -> (i32, i32) {
    %c0_i32 = arith.constant 0 : i32
    %c0_i32_0 = arith.constant 0 : i32
    return %arg0, %c0_i32 : i32, i32
  }
}

</mosaic_0001>

<bundles_post_ra>
// kernel: forward.1
= control target key start
LH: loop header
LB: loop body
LE: loop exit
PB: predicated region body
PF: predicated region fallthrough
CT: control target
= control target key end

     0   :  { %14 = vsyncpa [#allocation3], 0  ;;  %s1140_s0 = inlined_call_operand.vmem [shape: f32[8,24], index: 0, kind: input, shape index: {}]   ;;  %s1141_s1 = inlined_call_operand.vmem [shape: f32[8,128], index: 1, kind: input, shape index: {}, may-alias: {1,8}]   ;;  %s1142_s2 = inlined_call_operand.vmem [shape: f32[24,128], index: 2, kind: input, shape index: {}]   ;;  %s1143_s3 = inlined_call_operand.hbm [shape: f32[128,384], index: 3, kind: input, shape index: {}]   ;;  %s1144_s4 = inlined_call_operand.hbm [shape: f32[128,384], index: 4, kind: input, shape index: {}]   ;;  %s1145_s5 = inlined_call_operand.vmem [shape: f32[1,768], index: 5, kind: input, shape index: {}]   ;;  %s1146_s6 = inlined_call_operand.hbm [shape: f32[128,128], index: 6, kind: input, shape index: {}]   ;;  %s1147_s7 = inlined_call_operand.hbm [shape: f32[8,128], index: 7, kind: output, shape index: {0}]   ;;  %s1148_s8 = inlined_call_operand.vmem [shape: f32[8,128], index: 8, kind: output, shape index: {1}, may-alias: {1,8}]  }
   0x1   :  { %15 = vsyncpa [#allocation6], 0 }
   0x2   :  { %16 = vsyncpa [#allocation4], 0  ;;  %s977_s27 = smov [#allocation5]   ;;  %s978_s29 = smov [#allocation2]  }
   0x3   :  { %s40_s28 = sshll.u32 %s977_s27, 4  ;;  %s28_s30 = sshll.u32 %s978_s29, 4  ;;  %s41_s28 = int_to_ptr.vmem [resolvable:$true] %s40_s28  ;;  %s29_s30 = int_to_ptr.vmem [resolvable:$true] %s28_s30 }
   0x4   :  { %s899_s9 = scalar_lea.vmem %s41_s28, 6144  ;;  %p904_p1 = scmp.lt.s32.totalorder %s41_s28, %s41_s28 }
   0x5   :  { %p900_p0 = scmp.ne.s32.totalorder %s41_s28, %s899_s9  ;;  %p905_p2 = scmp.lt.s32.totalorder %s899_s9, %s899_s9 }
   0x7   :  { %p906_p3 = por %p905_p2, %p904_p1 }
   0x9   :  { %p907_p4 = pnand %p906_p3, %p900_p0 }
   0xb   :  { %910 = shalt.err (!%p907_p4)
}
   0xc   :  { %s979_s10 = smov 384   ;;  %s980_s11 = smov 24  }
   0xd   :  { %46 = dma.hbm_to_vmem [thread:$0]  %s1144_s4, 6144, %s41_s28, [#allocation6], %s979_s10, %s979_s10, %s980_s11  }
   0xe   :  { %s919_s14 = scalar_lea.vmem %s29_s30, 6144  ;;  %p924_p6 = scmp.lt.s32.totalorder %s29_s30, %s29_s30 }
   0xf   :  { %p920_p5 = scmp.ne.s32.totalorder %s29_s30, %s919_s14  ;;  %p925_p7 = scmp.lt.s32.totalorder %s919_s14, %s919_s14 }
  0x11   :  { %p926_p8 = por %p925_p7, %p924_p6 }
  0x13   :  { %p927_p9 = pnand %p926_p8, %p920_p5 }
  0x15   :  { %930 = shalt.err (!%p927_p9)
}
  0x16   :  { %34 = dma.hbm_to_vmem [thread:$0]  %s1143_s3, 6144, %s29_s30, [#allocation3], %s979_s10, %s979_s10, %s980_s11  }
  0x17   :  { %s981_s17 = smov [#allocation7]  }
  0x18   :  { %s54_s18 = sshll.u32 %s981_s17, 4  ;;  %s55_s18 = int_to_ptr.vmem [resolvable:$true] %s54_s18 }
  0x19   :  { %s939_s19 = scalar_lea.vmem %s55_s18, 2048  ;;  %p944_p11 = scmp.lt.s32.totalorder %s55_s18, %s55_s18 }
  0x1a   :  { %p940_p10 = scmp.ne.s32.totalorder %s55_s18, %s939_s19  ;;  %p945_p12 = scmp.lt.s32.totalorder %s939_s19, %s939_s19 }
  0x1c   :  { %p946_p13 = por %p945_p12, %p944_p11 }
  0x1e   :  { %p947_p0 = pnand %p946_p13, %p940_p10 }
  0x20   :  { %950 = shalt.err (!%p947_p0)
}
  0x21   :  { %s982_s4 = smov 128   ;;  %s983_s20 = smov 8  }
  0x22   :  { %60 = dma.hbm_to_vmem [thread:$0]  %s1146_s6, 2048, %s55_s18, [#allocation6], %s982_s4, %s982_s4, %s983_s20  }
  0x23   :  { %971 = dma.done.wait [#allocation3], 6144  }
  0x24   :  { %972 = vsyncadd [#allocation3], 4294961152 }
  0x25   :  { %973 = dma.done.wait [#allocation6], 8192  }
  0x26   :  { %974 = vsyncadd [#allocation6], 4294959104  ;;  %v984_v0 = vmov 0.0   ;;  %vm985_vm0 = vmmov 0   ;;  %v78_v1 = vld [vmem:[%s1142_s2 + $0x10] sm:$0xff]  ;;  %v77_v2 = vld [vmem:[%s1142_s2 + $0x8] sm:$0xff] }
  0x27   :  { %757 = vmatprep.subr.mxu0 %v984_v0  ;;  %763 = vmatprep.mubr.msk.f32.mxu0 %vm985_vm0, %v984_v0  ;;  %v206_v3 = vld [vmem:[#allocation2 + $0x170] sm:$0xff]  ;;  %v205_v4 = vld [vmem:[#allocation2 + $0x168] sm:$0xff]  ;;  %v76_v5 = vld [vmem:[%s1142_s2] sm:$0xff]  ;;  %vm85_vm1 = vcmask 195584   ;;  %s986_s16 = smov [#allocation8]  }
  0x28   :  { %288 = vmatprep.mubr.f32.mxu1 %v984_v0  ;;  %758 = vmatpush3.msra.mxu0 %v78_v1  ;;  %v203_v6 = vld [vmem:[#allocation2 + $0x158] sm:$0xff]  ;;  %v202_v7 = vld [vmem:[#allocation2 + $0x150] sm:$0xff]  ;;  %v70_v8 = vld [vmem:[%s1140_s0] sm:$0xff]  ;;  %s682_s17 = sshll.u32 %s986_s16, 4  ;;  %s683_s17 = int_to_ptr.vmem [resolvable:$true] %s682_s17 }
  0x29   :  { %759 = vmatprep.subr.mxu0 %v984_v0  ;;  %224 = vmatprep.subr.mxu1 %v206_v3  ;;  %v207_v9 = vld [vmem:[#allocation2 + $0x178] sm:$0xff]  ;;  %v200_v10 = vld [vmem:[#allocation2 + $0x140] sm:$0xff]  ;;  %v197_v13 = vld [vmem:[#allocation2 + $0x128] sm:$0xff]  ;;  %s951_s18 = scalar_lea.vmem %s683_s17, 128  ;;  %p956_p2 = scmp.lt.s32.totalorder %s683_s17, %s683_s17 }
  0x2a   :  { %760 = vmatpush3.msra.mxu0 %v77_v2  ;;  %225 = vmatpush1.msra.mxu1 %v205_v4  ;;  %v199_v11 = vld [vmem:[#allocation2 + $0x138] sm:$0xff]  ;;  %v204_v12 = vld [vmem:[#allocation2 + $0x160] sm:$0xff]  ;;  %v201_v15 = vld [vmem:[#allocation2 + $0x148] sm:$0xff]  ;;  %p952_p1 = scmp.ne.s32.totalorder %s683_s17, %s951_s18  ;;  %p957_p3 = scmp.lt.s32.totalorder %s951_s18, %s951_s18 }
  0x2b   :  { %761 = vmatprep.subr.mxu0 %v984_v0  ;;  %226 = vmatprep.subr.mxu1 %v203_v6  ;;  %v196_v14 = vld [vmem:[#allocation2 + $0x120] sm:$0xff]  ;;  %v194_v16 = vld [vmem:[#allocation2 + $0x110] sm:$0xff]  ;;  %v193_v17 = vld [vmem:[#allocation2 + $0x108] sm:$0xff] }
  0x2c   :  { %762 = vmatpush3.msra.mxu0 %v76_v5  ;;  %227 = vmatpush1.msra.mxu1 %v202_v7  ;;  %v198_v18 = vld [vmem:[#allocation2 + $0x130] sm:$0xff]  ;;  %v191_v19 = vld [vmem:[#allocation2 + $0xf8] sm:$0xff]  ;;  %v188_v22 = vld [vmem:[#allocation2 + $0xe0] sm:$0xff]  ;;  %p958_p4 = por %p957_p3, %p956_p2 }
  0x2d   :  { %764 = vmatmul.mubr.msk.f32.vlgmr.msra.gmra.mxu0 %vm85_vm1, %v70_v8  ;;  %766 = vmatprep.subr.mxu0 %v984_v0  ;;  %v190_v20 = vld [vmem:[#allocation2 + $0xf0] sm:$0xff]  ;;  %v195_v21 = vld [vmem:[#allocation2 + $0x118] sm:$0xff]  ;;  %v192_v24 = vld [vmem:[#allocation2 + $0x100] sm:$0xff] }
  0x2e   :  { %767 = vmatpush3.msra.mxu0 %v207_v9  ;;  %228 = vmatprep.subr.mxu1 %v200_v10  ;;  %v187_v23 = vld [vmem:[#allocation2 + $0xd8] sm:$0xff]  ;;  %v185_v25 = vld [vmem:[#allocation2 + $0xc8] sm:$0xff]  ;;  %v184_v26 = vld [vmem:[#allocation2 + $0xc0] sm:$0xff]  ;;  %p959_p5 = pnand %p958_p4, %p952_p1 }
  0x2f   :  { %768 = vmatprep.subr.mxu0 %v984_v0  ;;  %229 = vmatpush1.msra.mxu1 %v199_v11  ;;  %v189_v27 = vld [vmem:[#allocation2 + $0xe8] sm:$0xff]  ;;  %v182_v28 = vld [vmem:[#allocation2 + $0xb0] sm:$0xff]  ;;  %v179_v31 = vld [vmem:[#allocation2 + $0x98] sm:$0xff] }
  0x30   :  { %769 = vmatpush3.msra.mxu0 %v204_v12  ;;  %230 = vmatprep.subr.mxu1 %v197_v13  ;;  %v181_v29 = vld [vmem:[#allocation2 + $0xa8] sm:$0xff]  ;;  %v186_v30 = vld [vmem:[#allocation2 + $0xd0] sm:$0xff]  ;;  %v183_v33 = vld [vmem:[#allocation2 + $0xb8] sm:$0xff] }
  0x31   :  { %770 = vmatprep.subr.mxu0 %v984_v0  ;;  %231 = vmatpush1.msra.mxu1 %v196_v14  ;;  %v178_v32 = vld [vmem:[#allocation2 + $0x90] sm:$0xff]  ;;  %v176_v34 = vld [vmem:[#allocation2 + $0x80] sm:$0xff]  ;;  %v175_v35 = vld [vmem:[#allocation2 + $0x78] sm:$0xff] }
  0x32   :  { %771 = vmatpush3.msra.mxu0 %v201_v15  ;;  %232 = vmatprep.subr.mxu1 %v194_v16  ;;  %v180_v36 = vld [vmem:[#allocation2 + $0xa0] sm:$0xff]  ;;  %v173_v37 = vld [vmem:[#allocation2 + $0x68] sm:$0xff]  ;;  %v170_v40 = vld [vmem:[#allocation2 + $0x50] sm:$0xff] }
  0x33   :  { %772 = vmatprep.subr.mxu0 %v984_v0  ;;  %233 = vmatpush1.msra.mxu1 %v193_v17  ;;  %v172_v38 = vld [vmem:[#allocation2 + $0x60] sm:$0xff]  ;;  %v177_v39 = vld [vmem:[#allocation2 + $0x88] sm:$0xff]  ;;  %v174_v42 = vld [vmem:[#allocation2 + $0x70] sm:$0xff] }
  0x34   :  { %773 = vmatpush3.msra.mxu0 %v198_v18  ;;  %234 = vmatprep.subr.mxu1 %v191_v19  ;;  %v169_v41 = vld [vmem:[#allocation2 + $0x48] sm:$0xff]  ;;  %v167_v43 = vld [vmem:[#allocation2 + $0x38] sm:$0xff]  ;;  %v166_v44 = vld [vmem:[#allocation2 + $0x30] sm:$0xff] }
  0x35   :  { %774 = vmatprep.subr.mxu0 %v984_v0  ;;  %235 = vmatpush1.msra.mxu1 %v190_v20  ;;  %v171_v45 = vld [vmem:[#allocation2 + $0x58] sm:$0xff]  ;;  %v164_v46 = vld [vmem:[#allocation2 + $0x20] sm:$0xff]  ;;  %v161_v49 = vld [vmem:[#allocation2 + $0x8] sm:$0xff] }
  0x36   :  { %775 = vmatpush3.msra.mxu0 %v195_v21  ;;  %236 = vmatprep.subr.mxu1 %v188_v22  ;;  %v168_v47 = vld [vmem:[#allocation2 + $0x40] sm:$0xff]  ;;  %v163_v48 = vld [vmem:[#allocation2 + $0x18] sm:$0xff]  ;;  %v165_v50 = vld [vmem:[#allocation2 + $0x28] sm:$0xff] }
  0x37   :  { %776 = vmatprep.subr.mxu0 %v984_v0  ;;  %237 = vmatpush1.msra.mxu1 %v187_v23  ;;  %v160_v51 = vld [vmem:[#allocation2] sm:$0xff]  ;;  %v162_v52 = vld [vmem:[#allocation2 + $0x10] sm:$0xff]  ;;  %v410_v59 = vld [vmem:[#allocation5 + $0x168] sm:$0xff] }
  0x38   :  { %777 = vmatpush3.msra.mxu0 %v192_v24  ;;  %238 = vmatprep.subr.mxu1 %v185_v25  ;;  %v411_v53 = vld [vmem:[#allocation5 + $0x170] sm:$0xff]  ;;  %v696_v54 = vld [vmem:[%s1145_s5] ss:$0 sm:$0xff]  ;;  %v408_v60 = vld [vmem:[#allocation5 + $0x158] sm:$0xff] }
  0x39   :  { %778 = vmatprep.subr.mxu0 %v984_v0  ;;  %239 = vmatpush1.msra.mxu1 %v184_v26  ;;  %v412_v61 = vld [vmem:[#allocation5 + $0x178] sm:$0xff]  ;;  %v407_v62 = vld [vmem:[#allocation5 + $0x150] sm:$0xff]  ;;  %v405_v63 = vld [vmem:[#allocation5 + $0x140] sm:$0xff] }
  0x3a   :  { %779 = vmatpush3.msra.mxu0 %v189_v27  ;;  %240 = vmatprep.subr.mxu1 %v182_v28  ;;  %v409_v1 = vld [vmem:[#allocation5 + $0x160] sm:$0xff]  ;;  %v404_v2 = vld [vmem:[#allocation5 + $0x138] sm:$0xff]  ;;  %v402_v3 = vld [vmem:[#allocation5 + $0x128] sm:$0xff] }
  0x3b   :  { %780 = vmatprep.subr.mxu0 %v984_v0  ;;  %241 = vmatpush1.msra.mxu1 %v181_v29  ;;  %v406_v4 = vld [vmem:[#allocation5 + $0x148] sm:$0xff]  ;;  %v401_v5 = vld [vmem:[#allocation5 + $0x120] sm:$0xff]  ;;  %v399_v6 = vld [vmem:[#allocation5 + $0x110] sm:$0xff] }
  0x3c   :  { %781 = vmatpush3.msra.mxu0 %v186_v30  ;;  %242 = vmatprep.subr.mxu1 %v179_v31  ;;  %v403_v7 = vld [vmem:[#allocation5 + $0x130] sm:$0xff]  ;;  %v398_v8 = vld [vmem:[#allocation5 + $0x108] sm:$0xff]  ;;  %v396_v9 = vld [vmem:[#allocation5 + $0xf8] sm:$0xff] }
  0x3d   :  { %782 = vmatprep.subr.mxu0 %v984_v0  ;;  %243 = vmatpush1.msra.mxu1 %v178_v32  ;;  %v400_v10 = vld [vmem:[#allocation5 + $0x118] sm:$0xff]  ;;  %v395_v11 = vld [vmem:[#allocation5 + $0xf0] sm:$0xff]  ;;  %v393_v12 = vld [vmem:[#allocation5 + $0xe0] sm:$0xff] }
  0x3e   :  { %783 = vmatpush3.msra.mxu0 %v183_v33  ;;  %244 = vmatprep.subr.mxu1 %v176_v34  ;;  %v397_v13 = vld [vmem:[#allocation5 + $0x100] sm:$0xff]  ;;  %v392_v14 = vld [vmem:[#allocation5 + $0xd8] sm:$0xff]  ;;  %v390_v15 = vld [vmem:[#allocation5 + $0xc8] sm:$0xff] }
  0x3f   :  { %784 = vmatprep.subr.mxu0 %v984_v0  ;;  %245 = vmatpush1.msra.mxu1 %v175_v35  ;;  %v394_v16 = vld [vmem:[#allocation5 + $0xe8] sm:$0xff]  ;;  %v389_v17 = vld [vmem:[#allocation5 + $0xc0] sm:$0xff]  ;;  %v387_v18 = vld [vmem:[#allocation5 + $0xb0] sm:$0xff] }
  0x40   :  { %785 = vmatpush3.msra.mxu0 %v180_v36  ;;  %246 = vmatprep.subr.mxu1 %v173_v37  ;;  %v391_v19 = vld [vmem:[#allocation5 + $0xd0] sm:$0xff]  ;;  %v386_v20 = vld [vmem:[#allocation5 + $0xa8] sm:$0xff]  ;;  %v384_v21 = vld [vmem:[#allocation5 + $0x98] sm:$0xff] }
  0x41   :  { %786 = vmatprep.subr.mxu0 %v984_v0  ;;  %247 = vmatpush1.msra.mxu1 %v172_v38  ;;  %v388_v22 = vld [vmem:[#allocation5 + $0xb8] sm:$0xff]  ;;  %v383_v23 = vld [vmem:[#allocation5 + $0x90] sm:$0xff]  ;;  %v381_v24 = vld [vmem:[#allocation5 + $0x80] sm:$0xff] }
  0x42   :  { %787 = vmatpush3.msra.mxu0 %v177_v39  ;;  %248 = vmatprep.subr.mxu1 %v170_v40  ;;  %v385_v25 = vld [vmem:[#allocation5 + $0xa0] sm:$0xff]  ;;  %v380_v26 = vld [vmem:[#allocation5 + $0x78] sm:$0xff]  ;;  %v378_v27 = vld [vmem:[#allocation5 + $0x68] sm:$0xff] }
  0x43   :  { %788 = vmatprep.subr.mxu0 %v984_v0  ;;  %249 = vmatpush1.msra.mxu1 %v169_v41  ;;  %v382_v28 = vld [vmem:[#allocation5 + $0x88] sm:$0xff]  ;;  %v377_v29 = vld [vmem:[#allocation5 + $0x60] sm:$0xff]  ;;  %v375_v30 = vld [vmem:[#allocation5 + $0x50] sm:$0xff] }
  0x44   :  { %789 = vmatpush3.msra.mxu0 %v174_v42  ;;  %250 = vmatprep.subr.mxu1 %v167_v43  ;;  %v379_v31 = vld [vmem:[#allocation5 + $0x70] sm:$0xff]  ;;  %v374_v32 = vld [vmem:[#allocation5 + $0x48] sm:$0xff]  ;;  %v372_v33 = vld [vmem:[#allocation5 + $0x38] sm:$0xff] }
  0x45   :  { %790 = vmatprep.subr.mxu0 %v984_v0  ;;  %251 = vmatpush1.msra.mxu1 %v166_v44  ;;  %v376_v34 = vld [vmem:[#allocation5 + $0x58] sm:$0xff]  ;;  %v371_v35 = vld [vmem:[#allocation5 + $0x30] sm:$0xff]  ;;  %v369_v36 = vld [vmem:[#allocation5 + $0x20] sm:$0xff] }
  0x46   :  { %791 = vmatpush3.msra.mxu0 %v171_v45  ;;  %798 = vmatprep.mubr.msk.f32.mxu0 %vm985_vm0, %v984_v0  ;;  %v373_v37 = vld [vmem:[#allocation5 + $0x40] sm:$0xff]  ;;  %v368_v38 = vld [vmem:[#allocation5 + $0x18] sm:$0xff]  ;;  %v366_v39 = vld [vmem:[#allocation5 + $0x8] sm:$0xff] }
  0x47   :  { %792 = vmatprep.subr.mxu0 %v984_v0  ;;  %252 = vmatprep.subr.mxu1 %v164_v46  ;;  %v370_v40 = vld [vmem:[#allocation5 + $0x28] sm:$0xff]  ;;  %v365_v41 = vld [vmem:[#allocation5] sm:$0xff]  ;;  %v367_v43 = vld [vmem:[#allocation5 + $0x10] sm:$0xff] }
  0x48   :  { %793 = vmatpush3.msra.mxu0 %v168_v47  ;;  %253 = vmatpush1.msra.mxu1 %v163_v48  ;;  %v1098_v42 = vld [vmem:[%s1141_s1] sm:$0xff]  ;;  %v597_v44 = vld [vmem:[#allocation7 + $0x78] sm:$0xff]  ;;  %v596_v45 = vld [vmem:[#allocation7 + $0x70] sm:$0xff] }
  0x49   :  { %794 = vmatprep.subr.mxu0 %v984_v0  ;;  %254 = vmatprep.subr.mxu1 %v161_v49  ;;  %v595_v46 = vld [vmem:[#allocation7 + $0x68] sm:$0xff]  ;;  %v594_v47 = vld [vmem:[#allocation7 + $0x60] sm:$0xff]  ;;  %v593_v48 = vld [vmem:[#allocation7 + $0x58] sm:$0xff] }
  0x4a   :  { %795 = vmatpush3.msra.mxu0 %v165_v50  ;;  %255 = vmatpush1.msra.mxu1 %v160_v51  ;;  %v592_v49 = vld [vmem:[#allocation7 + $0x50] sm:$0xff]  ;;  %v591_v50 = vld [vmem:[#allocation7 + $0x48] sm:$0xff]  ;;  %v590_v51 = vld [vmem:[#allocation7 + $0x40] sm:$0xff] }
  0x4b   :  { %796 = vmatprep.subr.mxu0 %v984_v0  ;;  %413 = vmatprep.subr.mxu1 %v411_v53  ;;  %v588_v53 = vld [vmem:[#allocation7 + $0x30] sm:$0xff] }
  0x4c   :  { %797 = vmatpush3.msra.mxu0 %v162_v52  ;;  %v589_v52 = vld [vmem:[#allocation7 + $0x38] sm:$0xff] }
  0x4d   :  { %801 = vmatprep.subr.mxu0 %v984_v0 }
  0xed   :  { %v155_v55 = vpop.f32.mrf.mxu0 }
  0xee   :  { %v156_v56 = vadd.f32 %v696_v54, %v155_v55  ;;  %v587_v54 = vld [vmem:[#allocation7 + $0x28] sm:$0xff]  ;;  %v586_v55 = vld [vmem:[#allocation7 + $0x20] sm:$0xff] }
  0xef   :  { %v765_v57 = vpop.f32.mrf.mxu0 }
  0xf0   :  { %v159_v58 = vmax.f32 %v156_v56, 0.0  ;;  %v585_v56 = vld [vmem:[#allocation7 + $0x18] sm:$0xff]  ;;  %v584_v57 = vld [vmem:[#allocation7 + $0x10] sm:$0xff] }
  0xf2   :  { %289 = vmatmul.mubr.f32.vlgmr.msra.gmra.mxu1 %v159_v58  ;;  %799 = vmatmul.mubr.f32.vlgmr.msra.gmra.mxu0 %v159_v58  ;;  %v583_v58 = vld [vmem:[#allocation7 + $0x8] sm:$0xff] }
  0xf3   :  { %414 = vmatpush1.msra.mxu1 %v410_v59  ;;  %477 = vmatprep.mubr.f32.mxu1 %v984_v0  ;;  %v582_v59 = vld [vmem:[#allocation7] sm:$0xff] }
  0xf4   :  { %415 = vmatprep.subr.mxu1 %v408_v60  ;;  %802 = vmatpush3.msra.mxu0 %v412_v61 }
  0xf5   :  { %416 = vmatpush1.msra.mxu1 %v407_v62  ;;  %803 = vmatprep.subr.mxu0 %v984_v0  ;;  %v209_v62 = vlaneseq }
  0xf6   :  { %417 = vmatprep.subr.mxu1 %v405_v63  ;;  %804 = vmatpush3.msra.mxu0 %v409_v1 }
  0xf7   :  { %418 = vmatpush1.msra.mxu1 %v404_v2  ;;  %805 = vmatprep.subr.mxu0 %v984_v0  ;;  %v210_v63 = vshrl.u32 %v209_v62, 7  ;;  %v73_v2 = vld [vmem:[%s1145_s5 + $0x1] sm:$0x7] }
  0xf8   :  { %419 = vmatprep.subr.mxu1 %v402_v3  ;;  %806 = vmatpush3.msra.mxu0 %v406_v4 }
  0xf9   :  { %420 = vmatpush1.msra.mxu1 %v401_v5  ;;  %807 = vmatprep.subr.mxu0 %v984_v0  ;;  %v211_v1 = vsub.s32 0, %v210_v63  ;;  %v215_v5 = vsub.s32 1, %v210_v63 }
  0xfa   :  { %421 = vmatprep.subr.mxu1 %v399_v6  ;;  %808 = vmatpush3.msra.mxu0 %v403_v7 }
  0xfb   :  { %422 = vmatpush1.msra.mxu1 %v398_v8  ;;  %809 = vmatprep.subr.mxu0 %v984_v0  ;;  %v212_v4 = vrot.slane %v73_v2, %v211_v1 }
  0xfc   :  { %423 = vmatprep.subr.mxu1 %v396_v9  ;;  %810 = vmatpush3.msra.mxu0 %v400_v10  ;;  %v216_v9 = vrot.slane %v73_v2, %v215_v5 }
  0xfd   :  { %424 = vmatpush1.msra.mxu1 %v395_v11  ;;  %811 = vmatprep.subr.mxu0 %v984_v0 }
  0xfe   :  { %425 = vmatprep.subr.mxu1 %v393_v12  ;;  %812 = vmatpush3.msra.mxu0 %v397_v13 }
  0xff   :  { %426 = vmatpush1.msra.mxu1 %v392_v14  ;;  %813 = vmatprep.subr.mxu0 %v984_v0 }
 0x100   :  { %427 = vmatprep.subr.mxu1 %v390_v15  ;;  %814 = vmatpush3.msra.mxu0 %v394_v16 }
 0x101   :  { %428 = vmatpush1.msra.mxu1 %v389_v17  ;;  %815 = vmatprep.subr.mxu0 %v984_v0 }
 0x102   :  { %429 = vmatprep.subr.mxu1 %v387_v18  ;;  %816 = vmatpush3.msra.mxu0 %v391_v19  ;;  %v219_v19 = vsub.s32 2, %v210_v63 }
 0x103   :  { %430 = vmatpush1.msra.mxu1 %v386_v20  ;;  %817 = vmatprep.subr.mxu0 %v984_v0 }
 0x104   :  { %431 = vmatprep.subr.mxu1 %v384_v21  ;;  %818 = vmatpush3.msra.mxu0 %v388_v22  ;;  %v700_v21 = vld [vmem:[%s1145_s5 + $0x4] ss:$0 sm:$0xff]  ;;  %v220_v22 = vrot.slane %v73_v2, %v219_v19 }
 0x105   :  { %432 = vmatpush1.msra.mxu1 %v383_v23  ;;  %819 = vmatprep.subr.mxu0 %v984_v0 }
 0x106   :  { %433 = vmatprep.subr.mxu1 %v381_v24  ;;  %820 = vmatpush3.msra.mxu0 %v385_v25 }
 0x107   :  { %434 = vmatpush1.msra.mxu1 %v380_v26  ;;  %821 = vmatprep.subr.mxu0 %v984_v0 }
 0x108   :  { %435 = vmatprep.subr.mxu1 %v378_v27  ;;  %822 = vmatpush3.msra.mxu0 %v382_v28 }
 0x109   :  { %436 = vmatpush1.msra.mxu1 %v377_v29  ;;  %823 = vmatprep.subr.mxu0 %v984_v0 }
 0x10a   :  { %437 = vmatprep.subr.mxu1 %v375_v30  ;;  %824 = vmatpush3.msra.mxu0 %v379_v31 }
 0x10b   :  { %438 = vmatpush1.msra.mxu1 %v374_v32  ;;  %825 = vmatprep.subr.mxu0 %v984_v0 }
 0x10c   :  { %439 = vmatprep.subr.mxu1 %v372_v33  ;;  %826 = vmatpush3.msra.mxu0 %v376_v34 }
 0x10d   :  { %440 = vmatpush1.msra.mxu1 %v371_v35  ;;  %827 = vmatprep.subr.mxu0 %v984_v0  ;;  %v701_v35 = vld [vmem:[%s1145_s5 + $0x5] ss:$0 sm:$0xff] }
 0x10e   :  { %441 = vmatprep.subr.mxu1 %v369_v36  ;;  %828 = vmatpush3.msra.mxu0 %v373_v37 }
 0x10f   :  { %442 = vmatpush1.msra.mxu1 %v368_v38  ;;  %829 = vmatprep.subr.mxu0 %v984_v0 }
 0x110   :  { %443 = vmatprep.subr.mxu1 %v366_v39  ;;  %830 = vmatpush3.msra.mxu0 %v370_v40 }
 0x111   :  { %444 = vmatpush1.msra.mxu1 %v365_v41  ;;  %831 = vmatprep.subr.mxu0 %v984_v0 }
 0x112   :  { %478 = vmatmul.mubr.f32.vlgmr.msra.gmra.mxu1 %v1098_v42  ;;  %832 = vmatpush3.msra.mxu0 %v367_v43 }
 0x113   :  { %833 = vmatprep.mubr.msk.f32.mxu0 %vm985_vm0, %v984_v0  ;;  %836 = vmatprep.subr.mxu1 %v984_v0 }
 0x114   :  { %834 = vmatmul.mubr.f32.vlgmr.msra.gmra.mxu0 %v1098_v42  ;;  %868 = vmatprep.mubr.msk.f32.mxu1 %vm985_vm0, %v984_v0 }
 0x115   :  { %837 = vmatpush3.msra.mxu1 %v597_v44 }
 0x116   :  { %838 = vmatprep.subr.mxu1 %v984_v0 }
 0x117   :  { %839 = vmatpush3.msra.mxu1 %v596_v45 }
 0x118   :  { %840 = vmatprep.subr.mxu1 %v984_v0 }
 0x119   :  { %841 = vmatpush3.msra.mxu1 %v595_v46 }
 0x11a   :  { %842 = vmatprep.subr.mxu1 %v984_v0 }
 0x11b   :  { %843 = vmatpush3.msra.mxu1 %v594_v47 }
 0x11c   :  { %844 = vmatprep.subr.mxu1 %v984_v0 }
 0x11d   :  { %845 = vmatpush3.msra.mxu1 %v593_v48 }
 0x11e   :  { %846 = vmatprep.subr.mxu1 %v984_v0 }
 0x11f   :  { %847 = vmatpush3.msra.mxu1 %v592_v49 }
 0x120   :  { %848 = vmatprep.subr.mxu1 %v984_v0 }
 0x121   :  { %849 = vmatpush3.msra.mxu1 %v591_v50 }
 0x122   :  { %850 = vmatprep.subr.mxu1 %v984_v0 }
 0x123   :  { %851 = vmatpush3.msra.mxu1 %v590_v51 }
 0x124   :  { %852 = vmatprep.subr.mxu1 %v984_v0 }
 0x125   :  { %853 = vmatpush3.msra.mxu1 %v589_v52 }
 0x126   :  { %854 = vmatprep.subr.mxu1 %v984_v0 }
 0x127   :  { %855 = vmatpush3.msra.mxu1 %v588_v53 }
 0x128   :  { %856 = vmatprep.subr.mxu1 %v984_v0 }
 0x129   :  { %857 = vmatpush3.msra.mxu1 %v587_v54 }
 0x12a   :  { %858 = vmatprep.subr.mxu1 %v984_v0 }
 0x12b   :  { %859 = vmatpush3.msra.mxu1 %v586_v55 }
 0x12c   :  { %860 = vmatprep.subr.mxu1 %v984_v0 }
 0x12d   :  { %861 = vmatpush3.msra.mxu1 %v585_v56 }
 0x12e   :  { %862 = vmatprep.subr.mxu1 %v984_v0 }
 0x12f   :  { %863 = vmatpush3.msra.mxu1 %v584_v57 }
 0x130   :  { %864 = vmatprep.subr.mxu1 %v984_v0 }
 0x131   :  { %865 = vmatpush3.msra.mxu1 %v583_v58 }
 0x132   :  { %866 = vmatprep.subr.mxu1 %v984_v0 }
 0x133   :  { %867 = vmatpush3.msra.mxu1 %v582_v59 }
 0x1b2   :  { %v361_v60 = vpop.f32.mrf.mxu0  ;;  %v290_v3 = vpop.f32.mrf.mxu1 }
 0x1b3   :  { %v291_v7 = vadd.f32 %v290_v3, %v212_v4  ;;  %v362_v26 = vadd.f32 %v361_v60, %v220_v22 }
 0x1b4   :  { %v800_v61 = vpop.f32.mrf.mxu0  ;;  %v292_v6 = vpop.f32.mrf.mxu1 }
 0x1b5   :  { %v293_v14 = vadd.f32 %v292_v6, %v216_v9 }
 0x1d2   :  { %v479_v8 = vpop.f32.mrf.mxu1 }
 0x1d3   :  { %v554_v10 = vadd.f32 %v479_v8, %v291_v7 }
 0x1d4   :  { %v550_v11 = vpop.f32.mrf.mxu0  ;;  %v481_v12 = vpop.f32.mrf.mxu1 }
 0x1d5   :  { %v698_v0 = vmul.f32 -1.442695, %v554_v10  ;;  %v561_v15 = vadd.f32 %v481_v12, %v293_v14  ;;  %v574_v24 = vadd.f32 %v700_v21, %v550_v11 }
 0x1d6   :  { %v835_v13 = vpop.f32.mrf.mxu0 }
 0x1d7   :  { %881 = vpow2.f32 %v698_v0  ;;  %v699_v16 = vmul.f32 -1.442695, %v561_v15 }
 0x1d9   :  { %883 = vpow2.f32 %v699_v16 }
 0x1e4   :  { %v882_v17 = vpop.eup %881 }
 0x1e5   :  { %v558_v18 = vadd.f32 1.0, %v882_v17 }
 0x1e6   :  { %v884_v20 = vpop.eup %883 }
 0x1e7   :  { %885 = vrcp.f32 %v558_v18  ;;  %v565_v23 = vadd.f32 1.0, %v884_v20 }
 0x1e9   :  { %887 = vrcp.f32 %v565_v23 }
 0x1f4   :  { %v886_v25 = vpop.eup %885 }
 0x1f5   :  { %v575_v27 = vmul.f32 %v886_v25, %v574_v24 }
 0x1f6   :  { %v888_v29 = vpop.eup %887 }
 0x1f7   :  { %v576_v28 = vadd.f32 %v575_v27, %v362_v26  ;;  %v578_v30 = vsub.f32 1.0, %v888_v29  ;;  %v580_v33 = vmul.f32 %v888_v29, %v1098_v42 }
 0x1f9   :  { %889 = vtanh.f32 %v576_v28 }
 0x206   :  { %v890_v31 = vpop.eup %889 }
 0x207   :  { %v579_v32 = vmul.f32 %v890_v31, %v578_v30 }
 0x209   :  { %v581_v34 = vadd.f32 %v580_v33, %v579_v32 }
 0x20b   :  { %869 = vmatmul.mubr.f32.vlgmr.msra.gmra.mxu1 %v581_v34  ;;  %675 = vst [vmem:[%s1148_s8] sm:$0xff] %v581_v34 }
 0x2cb   :  { %v670_v36 = vpop.f32.mrf.mxu1 }
 0x2cc   :  { %v671_v37 = vadd.f32 %v701_v35, %v670_v36 }
 0x2cd   :  { %v870_v38 = vpop.f32.mrf.mxu1 }
 0x2ce   :  { %674 = vst [vmem:[#allocation8] sm:$0xff] %v671_v37 }
 0x2cf   :  { %962 = shalt.err (!%p959_p5)
}
 0x2d0   :  { %685 = dma.vmem_to_hbm [thread:$0]  %s683_s17, 128, %s1147_s7, [#allocation4]  }
 0x2d1   :  { %975 = dma.done.wait [#allocation4], 128  }
 0x2d2   :  { %976 = vsyncadd [#allocation4], 4294967168 }
 0x2d3   :  { %693 = vsyncpa [#allocation3], 1 }
 0x2d4   :  { %694 = vsyncpa [#allocation6], 1 }
 0x2d5   :  { %695 = vsyncpa [#allocation4], 1 }

</bundles_post_ra>
